<compile_context>
chip_gen: v7x
topology: tpu7x:2x2x1
jax: 0.10.0
libtpu: 0.0.40
codegen_flags: <defaults>
</compile_context>

<pallas_src>
import jax
import jax.numpy as jnp
from jax.experimental import pallas as pl
from jax.experimental.pallas import tpu as pltpu

_LANE = 128


def _dist_regressor_kernel(costs_ref, inv_ref, inv_depth_ref, norm_ref):
    # costs_ref:     (1, 1, D, TR, 128) VMEM -- channel-0 cost tile, one batch elem
    # inv_ref:       (D,)               SMEM -- bf / dist_cands (module buffer, flat)
    # inv_depth_ref: (1, 1, TR, 128)    VMEM
    # norm_ref:      (1, D, TR, 128)    VMEM
    n_d = costs_ref.shape[2]                      # D is small & static (10): fully unrolled

    # Pass 1: elementwise max across the D planes (pure VPU, no XLU).
    m = costs_ref[0, 0, 0]
    for di in range(1, n_d):
        m = jnp.maximum(m, costs_ref[0, 0, di])

    # Pass 2: per-plane exp, staged straight into norm_ref (no (D,TR,128) temp),
    # accumulating the softmax denominator and the inv-dist weighted sum.
    s = jnp.zeros_like(m)
    acc = jnp.zeros_like(m)
    for di in range(n_d):
        e_d = jnp.exp(costs_ref[0, 0, di] - m)
        norm_ref[0, di] = e_d.astype(norm_ref.dtype)
        s = s + e_d
        acc = acc + e_d * inv_ref[di]             # scalar weight read from SMEM

    # Exact reciprocal keeps the 1e-5 accuracy of the reference; the extra VALU
    # refinement is hidden under the HBM bound.
    inv_s = pl.reciprocal(s, approx=False)

    # Pass 3: normalize the staged planes in place.
    for di in range(n_d):
        norm_ref[0, di] = (norm_ref[0, di] * inv_s).astype(norm_ref.dtype)

    inv_depth_ref[0, 0] = (acc * inv_s).astype(inv_depth_ref.dtype)


def _cdiv(a: int, b: int) -> int:
    return -(-a // b)


def _chip_defaults():
    """Per-generation (max_rows, vmem_limit_bytes) for this HBM-bound kernel."""
    kind = ""
    try:
        kind = jax.devices()[0].device_kind.lower()
    except Exception:
        pass
    if "v6" in kind:
        # 128 MiB physical VMEM: go big, raise scoped limit above the 32 MiB default.
        return 1024, 64 * 1024 * 1024
    if "v5" in kind:
        # Default scoped VMEM is only 16 MiB; TR=512 needs ~12 MiB double-buffered.
        return 512, 32 * 1024 * 1024
    # v7x (64 MiB physical / 32 MiB scoped default) or unknown: stay within 32 MiB.
    return 512, 32 * 1024 * 1024


def distance_regressor_fixed_candidates(costs: jax.Array, inv_dist_idx: jax.Array,
                                         *, max_rows: int | None = None,
                                         vmem_limit_bytes: int | None = None):
    """costs: (B, C, D, H, W) f32;  inv_dist_idx: (D,) f32.
    Returns (inv_depths (B, 1, H, W), norm_costs (B, D, H, W))."""
    B, C, D, H, W = costs.shape
    assert inv_dist_idx.shape == (D,)

    auto_rows, auto_vmem = _chip_defaults()
    if max_rows is None:
        max_rows = auto_rows
    if vmem_limit_bytes is None:
        vmem_limit_bytes = auto_vmem

    # Flatten spatial dims; pad to a multiple of 128 so every store is lane-dense.
    HW = H * W
    R = _cdiv(HW, _LANE)
    HWp = R * _LANE
    if HWp == HW:
        x = costs.reshape(B, C, D, R, _LANE)           # free row-major reshape
    else:
        xf = costs.reshape(B, C, D, HW)
        xf = jnp.pad(xf, ((0, 0), (0, 0), (0, 0), (0, HWp - HW)))
        x = xf.reshape(B, C, D, R, _LANE)

    # Row tile: a multiple of 8 sublanes (or the full extent when R <= 8).
    if R <= 8:
        TR = R
    else:
        TR = max(8, (min(R, max_rows) // 8) * 8)
        # v7x megacore: make sure there are >= 2 parallel grid steps when B == 1
        # so neither TensorCore is idle.
        if B == 1 and _cdiv(R, TR) < 2:
            TR = min(TR, ((_cdiv(R, 2) + 7) // 8) * 8)

    grid = (B, _cdiv(R, TR))

    out_shape = (
        jax.ShapeDtypeStruct((B, 1, R, _LANE), costs.dtype),   # inv_depths (flat spatial)
        jax.ShapeDtypeStruct((B, D, R, _LANE), costs.dtype),   # norm_costs (flat spatial)
    )

    grid_spec = pltpu.PrefetchScalarGridSpec(
        num_scalar_prefetch=0,
        grid=grid,
        in_specs=[
            # select channel 0 (block index 0 on the channel axis) -> costs[:, 0]
            pl.BlockSpec((1, 1, D, TR, _LANE), lambda b, r: (b, 0, 0, r, 0)),
            # small per-candidate weights live in SMEM, whole array, untiled
            pl.BlockSpec(memory_space=pltpu.MemorySpace.SMEM),
        ],
        out_specs=[
            pl.BlockSpec((1, 1, TR, _LANE), lambda b, r: (b, 0, r, 0)),
            pl.BlockSpec((1, D, TR, _LANE), lambda b, r: (b, 0, r, 0)),
        ],
    )

    fn = pl.pallas_call(
        _dist_regressor_kernel,
        out_shape=out_shape,
        grid_spec=grid_spec,
        compiler_params=pltpu.CompilerParams(
            dimension_semantics=("parallel", "parallel"),
            vmem_limit_bytes=vmem_limit_bytes,
        ),
    )
    inv_depths, norm_costs = fn(x, inv_dist_idx)

    inv_depths = inv_depths.reshape(B, 1, HWp)[:, :, :HW].reshape(B, 1, H, W)
    norm_costs = norm_costs.reshape(B, D, HWp)[:, :, :HW].reshape(B, D, H, W)
    return inv_depths, norm_costs


def _check(costs, inv_dist_idx, **kw):
    inv_depths, norm_costs = distance_regressor_fixed_candidates(costs, inv_dist_idx, **kw)
    jax.block_until_ready((inv_depths, norm_costs))

    # Pure-JAX reference of the PyTorch semantics.
    ref_norm = jax.nn.softmax(costs[:, 0], axis=1)                                 # (B, D, H, W)
    ref_inv = jnp.sum(ref_norm * inv_dist_idx[None, :, None, None], axis=1,
                      keepdims=True)                                               # (B, 1, H, W)
    B, _, _, H, W = costs.shape
    D = inv_dist_idx.shape[0]
    assert inv_depths.shape == (B, 1, H, W) and norm_costs.shape == (B, D, H, W)
    assert jnp.allclose(norm_costs, ref_norm, atol=1e-5, rtol=1e-5)
    assert jnp.allclose(inv_depths, ref_inv, atol=1e-4, rtol=1e-4)


if __name__ == "__main__":
    # Module "parameters" (buffers) built deterministically from __init__ defaults.
    bf = 96.0
    dist_cands = jnp.array([0.5, 1, 1.5, 2, 5, 10, 20, 30, 50, 100], dtype=jnp.float32)
    inv_dist_idx = bf / dist_cands               # (D,) == inv_dist_idx buffer flattened
    D = dist_cands.shape[0]                      # 10 candidates

    key = jax.random.PRNGKey(0)
    k1, k2, k3, k4 = jax.random.split(key, 4)

    # Main small case: B=2, C=4, H=W=16 (lane-dense path, HW=256 -> R=2, single tile).
    costs = jax.random.normal(k1, (2, 4, D, 16, 16), dtype=jnp.float32)
    _check(costs, inv_dist_idx)

    # Multi-row-tile + clipped-last-block case (HW=1920 -> R=15 -> TR=8, 2 row steps).
    costs2 = jax.random.normal(k2, (2, 2, D, 24, 80), dtype=jnp.float32)
    _check(costs2, inv_dist_idx)

    # Padded path (H*W not a multiple of 128): HW=320 padded to 384, sliced back.
    costs3 = jax.random.normal(k3, (2, 2, D, 16, 20), dtype=jnp.float32)
    _check(costs3, inv_dist_idx)

    # B=1 megacore case: row axis forced to >= 2 tiles (HW=2048 -> R=16 -> TR=8).
    costs4 = jax.random.normal(k4, (1, 2, D, 32, 64), dtype=jnp.float32)
    _check(costs4, inv_dist_idx)

    print("KERNEL_OK")
</pallas_src>

<mosaic_0001>
module attributes {stable_mosaic.version = 11 : i64} {
  func.func @_dist_regressor_kernel(%arg0: i32, %arg1: i32, %arg2: memref<1x1x10x2x128xf32, #tpu.memory_space<vmem>>, %arg3: memref<10xf32, #tpu.memory_space<smem>>, %arg4: memref<1x1x2x128xf32, #tpu.memory_space<vmem>>, %arg5: memref<1x10x2x128xf32, #tpu.memory_space<vmem>>) attributes {dimension_semantics = [#tpu.dimension_semantics<parallel>, #tpu.dimension_semantics<parallel>], iteration_bounds = array<i64: 2, 1>, scalar_prefetch = 0 : i64, scratch_operands = 0 : i64, tpu.core_type = #tpu.core_type<tc>, window_params = [{transform_indices = @transform_0, window_bounds = array<i64: 1, 1, 10, 2, 128>}, {transform_indices = @transform_1, window_bounds = array<i64: 10>}, {transform_indices = @transform_2, window_bounds = array<i64: 1, 1, 2, 128>}, {transform_indices = @transform_3, window_bounds = array<i64: 1, 10, 2, 128>}]} {
    %c0 = arith.constant 0 : index
    %c0_0 = arith.constant 0 : index
    %c0_1 = arith.constant 0 : index
    %c0_2 = arith.constant 0 : index
    %c0_3 = arith.constant 0 : index
    %0 = vector.load %arg2[%c0, %c0_0, %c0_1, %c0_2, %c0_3] : memref<1x1x10x2x128xf32, #tpu.memory_space<vmem>>, vector<1x1x1x2x128xf32>
    %1 = vector.shape_cast %0 : vector<1x1x1x2x128xf32> to vector<2x128xf32>
    %c0_4 = arith.constant 0 : index
    %c0_5 = arith.constant 0 : index
    %c1 = arith.constant 1 : index
    %c0_6 = arith.constant 0 : index
    %c0_7 = arith.constant 0 : index
    %2 = vector.load %arg2[%c0_4, %c0_5, %c1, %c0_6, %c0_7] : memref<1x1x10x2x128xf32, #tpu.memory_space<vmem>>, vector<1x1x1x2x128xf32>
    %3 = vector.shape_cast %2 : vector<1x1x1x2x128xf32> to vector<2x128xf32>
    %4 = arith.maximumf %1, %3 : vector<2x128xf32>
    %c0_8 = arith.constant 0 : index
    %c0_9 = arith.constant 0 : index
    %c2 = arith.constant 2 : index
    %c0_10 = arith.constant 0 : index
    %c0_11 = arith.constant 0 : index
    %5 = vector.load %arg2[%c0_8, %c0_9, %c2, %c0_10, %c0_11] : memref<1x1x10x2x128xf32, #tpu.memory_space<vmem>>, vector<1x1x1x2x128xf32>
    %6 = vector.shape_cast %5 : vector<1x1x1x2x128xf32> to vector<2x128xf32>
    %7 = arith.maximumf %4, %6 : vector<2x128xf32>
    %c0_12 = arith.constant 0 : index
    %c0_13 = arith.constant 0 : index
    %c3 = arith.constant 3 : index
    %c0_14 = arith.constant 0 : index
    %c0_15 = arith.constant 0 : index
    %8 = vector.load %arg2[%c0_12, %c0_13, %c3, %c0_14, %c0_15] : memref<1x1x10x2x128xf32, #tpu.memory_space<vmem>>, vector<1x1x1x2x128xf32>
    %9 = vector.shape_cast %8 : vector<1x1x1x2x128xf32> to vector<2x128xf32>
    %10 = arith.maximumf %7, %9 : vector<2x128xf32>
    %c0_16 = arith.constant 0 : index
    %c0_17 = arith.constant 0 : index
    %c4 = arith.constant 4 : index
    %c0_18 = arith.constant 0 : index
    %c0_19 = arith.constant 0 : index
    %11 = vector.load %arg2[%c0_16, %c0_17, %c4, %c0_18, %c0_19] : memref<1x1x10x2x128xf32, #tpu.memory_space<vmem>>, vector<1x1x1x2x128xf32>
    %12 = vector.shape_cast %11 : vector<1x1x1x2x128xf32> to vector<2x128xf32>
    %13 = arith.maximumf %10, %12 : vector<2x128xf32>
    %c0_20 = arith.constant 0 : index
    %c0_21 = arith.constant 0 : index
    %c5 = arith.constant 5 : index
    %c0_22 = arith.constant 0 : index
    %c0_23 = arith.constant 0 : index
    %14 = vector.load %arg2[%c0_20, %c0_21, %c5, %c0_22, %c0_23] : memref<1x1x10x2x128xf32, #tpu.memory_space<vmem>>, vector<1x1x1x2x128xf32>
    %15 = vector.shape_cast %14 : vector<1x1x1x2x128xf32> to vector<2x128xf32>
    %16 = arith.maximumf %13, %15 : vector<2x128xf32>
    %c0_24 = arith.constant 0 : index
    %c0_25 = arith.constant 0 : index
    %c6 = arith.constant 6 : index
    %c0_26 = arith.constant 0 : index
    %c0_27 = arith.constant 0 : index
    %17 = vector.load %arg2[%c0_24, %c0_25, %c6, %c0_26, %c0_27] : memref<1x1x10x2x128xf32, #tpu.memory_space<vmem>>, vector<1x1x1x2x128xf32>
    %18 = vector.shape_cast %17 : vector<1x1x1x2x128xf32> to vector<2x128xf32>
    %19 = arith.maximumf %16, %18 : vector<2x128xf32>
    %c0_28 = arith.constant 0 : index
    %c0_29 = arith.constant 0 : index
    %c7 = arith.constant 7 : index
    %c0_30 = arith.constant 0 : index
    %c0_31 = arith.constant 0 : index
    %20 = vector.load %arg2[%c0_28, %c0_29, %c7, %c0_30, %c0_31] : memref<1x1x10x2x128xf32, #tpu.memory_space<vmem>>, vector<1x1x1x2x128xf32>
    %21 = vector.shape_cast %20 : vector<1x1x1x2x128xf32> to vector<2x128xf32>
    %22 = arith.maximumf %19, %21 : vector<2x128xf32>
    %c0_32 = arith.constant 0 : index
    %c0_33 = arith.constant 0 : index
    %c8 = arith.constant 8 : index
    %c0_34 = arith.constant 0 : index
    %c0_35 = arith.constant 0 : index
    %23 = vector.load %arg2[%c0_32, %c0_33, %c8, %c0_34, %c0_35] : memref<1x1x10x2x128xf32, #tpu.memory_space<vmem>>, vector<1x1x1x2x128xf32>
    %24 = vector.shape_cast %23 : vector<1x1x1x2x128xf32> to vector<2x128xf32>
    %25 = arith.maximumf %22, %24 : vector<2x128xf32>
    %c0_36 = arith.constant 0 : index
    %c0_37 = arith.constant 0 : index
    %c9 = arith.constant 9 : index
    %c0_38 = arith.constant 0 : index
    %c0_39 = arith.constant 0 : index
    %26 = vector.load %arg2[%c0_36, %c0_37, %c9, %c0_38, %c0_39] : memref<1x1x10x2x128xf32, #tpu.memory_space<vmem>>, vector<1x1x1x2x128xf32>
    %27 = vector.shape_cast %26 : vector<1x1x1x2x128xf32> to vector<2x128xf32>
    %28 = arith.maximumf %25, %27 : vector<2x128xf32>
    %cst = arith.constant 0.000000e+00 : f32
    %29 = vector.broadcast %cst : f32 to vector<2x128xf32>
    %cst_40 = arith.constant 0.000000e+00 : f32
    %30 = vector.broadcast %cst_40 : f32 to vector<2x128xf32>
    %c0_41 = arith.constant 0 : index
    %c0_42 = arith.constant 0 : index
    %c0_43 = arith.constant 0 : index
    %c0_44 = arith.constant 0 : index
    %c0_45 = arith.constant 0 : index
    %31 = vector.load %arg2[%c0_41, %c0_42, %c0_43, %c0_44, %c0_45] : memref<1x1x10x2x128xf32, #tpu.memory_space<vmem>>, vector<1x1x1x2x128xf32>
    %32 = vector.shape_cast %31 : vector<1x1x1x2x128xf32> to vector<2x128xf32>
    %33 = arith.subf %32, %28 : vector<2x128xf32>
    %34 = math.exp %33 : vector<2x128xf32>
    %c0_46 = arith.constant 0 : index
    %c0_47 = arith.constant 0 : index
    %c0_48 = arith.constant 0 : index
    %c0_49 = arith.constant 0 : index
    %35 = vector.load %arg5[%c0_46, %c0_47, %c0_48, %c0_49] : memref<1x10x2x128xf32, #tpu.memory_space<vmem>>, vector<1x1x2x128xf32>
    %36 = vector.shape_cast %35 : vector<1x1x2x128xf32> to vector<2x128xf32>
    %37 = vector.shape_cast %34 : vector<2x128xf32> to vector<1x1x2x128xf32>
    tpu.vector_store %arg5[%c0_46, %c0_47, %c0_48, %c0_49], %37 {strides = array<i32>} : memref<1x10x2x128xf32, #tpu.memory_space<vmem>>, vector<1x1x2x128xf32>,
    %38 = arith.addf %29, %34 : vector<2x128xf32>
    %c0_50 = arith.constant 0 : index
    %39 = memref.load %arg3[%c0_50] : memref<10xf32, #tpu.memory_space<smem>>
    %40 = vector.broadcast %39 : f32 to vector<2x128xf32>
    %41 = arith.mulf %34, %40 : vector<2x128xf32>
    %42 = arith.addf %30, %41 : vector<2x128xf32>
    %c0_51 = arith.constant 0 : index
    %c0_52 = arith.constant 0 : index
    %c1_53 = arith.constant 1 : index
    %c0_54 = arith.constant 0 : index
    %c0_55 = arith.constant 0 : index
    %43 = vector.load %arg2[%c0_51, %c0_52, %c1_53, %c0_54, %c0_55] : memref<1x1x10x2x128xf32, #tpu.memory_space<vmem>>, vector<1x1x1x2x128xf32>
    %44 = vector.shape_cast %43 : vector<1x1x1x2x128xf32> to vector<2x128xf32>
    %45 = arith.subf %44, %28 : vector<2x128xf32>
    %46 = math.exp %45 : vector<2x128xf32>
    %c0_56 = arith.constant 0 : index
    %c1_57 = arith.constant 1 : index
    %c0_58 = arith.constant 0 : index
    %c0_59 = arith.constant 0 : index
    %47 = vector.load %arg5[%c0_56, %c1_57, %c0_58, %c0_59] : memref<1x10x2x128xf32, #tpu.memory_space<vmem>>, vector<1x1x2x128xf32>
    %48 = vector.shape_cast %47 : vector<1x1x2x128xf32> to vector<2x128xf32>
    %49 = vector.shape_cast %46 : vector<2x128xf32> to vector<1x1x2x128xf32>
    tpu.vector_store %arg5[%c0_56, %c1_57, %c0_58, %c0_59], %49 {strides = array<i32>} : memref<1x10x2x128xf32, #tpu.memory_space<vmem>>, vector<1x1x2x128xf32>,
    %50 = arith.addf %38, %46 : vector<2x128xf32>
    %c1_60 = arith.constant 1 : index
    %51 = memref.load %arg3[%c1_60] : memref<10xf32, #tpu.memory_space<smem>>
    %52 = vector.broadcast %51 : f32 to vector<2x128xf32>
    %53 = arith.mulf %46, %52 : vector<2x128xf32>
    %54 = arith.addf %42, %53 : vector<2x128xf32>
    %c0_61 = arith.constant 0 : index
    %c0_62 = arith.constant 0 : index
    %c2_63 = arith.constant 2 : index
    %c0_64 = arith.constant 0 : index
    %c0_65 = arith.constant 0 : index
    %55 = vector.load %arg2[%c0_61, %c0_62, %c2_63, %c0_64, %c0_65] : memref<1x1x10x2x128xf32, #tpu.memory_space<vmem>>, vector<1x1x1x2x128xf32>
    %56 = vector.shape_cast %55 : vector<1x1x1x2x128xf32> to vector<2x128xf32>
    %57 = arith.subf %56, %28 : vector<2x128xf32>
    %58 = math.exp %57 : vector<2x128xf32>
    %c0_66 = arith.constant 0 : index
    %c2_67 = arith.constant 2 : index
    %c0_68 = arith.constant 0 : index
    %c0_69 = arith.constant 0 : index
    %59 = vector.load %arg5[%c0_66, %c2_67, %c0_68, %c0_69] : memref<1x10x2x128xf32, #tpu.memory_space<vmem>>, vector<1x1x2x128xf32>
    %60 = vector.shape_cast %59 : vector<1x1x2x128xf32> to vector<2x128xf32>
    %61 = vector.shape_cast %58 : vector<2x128xf32> to vector<1x1x2x128xf32>
    tpu.vector_store %arg5[%c0_66, %c2_67, %c0_68, %c0_69], %61 {strides = array<i32>} : memref<1x10x2x128xf32, #tpu.memory_space<vmem>>, vector<1x1x2x128xf32>,
    %62 = arith.addf %50, %58 : vector<2x128xf32>
    %c2_70 = arith.constant 2 : index
    %63 = memref.load %arg3[%c2_70] : memref<10xf32, #tpu.memory_space<smem>>
    %64 = vector.broadcast %63 : f32 to vector<2x128xf32>
    %65 = arith.mulf %58, %64 : vector<2x128xf32>
    %66 = arith.addf %54, %65 : vector<2x128xf32>
    %c0_71 = arith.constant 0 : index
    %c0_72 = arith.constant 0 : index
    %c3_73 = arith.constant 3 : index
    %c0_74 = arith.constant 0 : index
    %c0_75 = arith.constant 0 : index
    %67 = vector.load %arg2[%c0_71, %c0_72, %c3_73, %c0_74, %c0_75] : memref<1x1x10x2x128xf32, #tpu.memory_space<vmem>>, vector<1x1x1x2x128xf32>
    %68 = vector.shape_cast %67 : vector<1x1x1x2x128xf32> to vector<2x128xf32>
    %69 = arith.subf %68, %28 : vector<2x128xf32>
    %70 = math.exp %69 : vector<2x128xf32>
    %c0_76 = arith.constant 0 : index
    %c3_77 = arith.constant 3 : index
    %c0_78 = arith.constant 0 : index
    %c0_79 = arith.constant 0 : index
    %71 = vector.load %arg5[%c0_76, %c3_77, %c0_78, %c0_79] : memref<1x10x2x128xf32, #tpu.memory_space<vmem>>, vector<1x1x2x128xf32>
    %72 = vector.shape_cast %71 : vector<1x1x2x128xf32> to vector<2x128xf32>
    %73 = vector.shape_cast %70 : vector<2x128xf32> to vector<1x1x2x128xf32>
    tpu.vector_store %arg5[%c0_76, %c3_77, %c0_78, %c0_79], %73 {strides = array<i32>} : memref<1x10x2x128xf32, #tpu.memory_space<vmem>>, vector<1x1x2x128xf32>,
    %74 = arith.addf %62, %70 : vector<2x128xf32>
    %c3_80 = arith.constant 3 : index
    %75 = memref.load %arg3[%c3_80] : memref<10xf32, #tpu.memory_space<smem>>
    %76 = vector.broadcast %75 : f32 to vector<2x128xf32>
    %77 = arith.mulf %70, %76 : vector<2x128xf32>
    %78 = arith.addf %66, %77 : vector<2x128xf32>
    %c0_81 = arith.constant 0 : index
    %c0_82 = arith.constant 0 : index
    %c4_83 = arith.constant 4 : index
    %c0_84 = arith.constant 0 : index
    %c0_85 = arith.constant 0 : index
    %79 = vector.load %arg2[%c0_81, %c0_82, %c4_83, %c0_84, %c0_85] : memref<1x1x10x2x128xf32, #tpu.memory_space<vmem>>, vector<1x1x1x2x128xf32>
    %80 = vector.shape_cast %79 : vector<1x1x1x2x128xf32> to vector<2x128xf32>
    %81 = arith.subf %80, %28 : vector<2x128xf32>
    %82 = math.exp %81 : vector<2x128xf32>
    %c0_86 = arith.constant 0 : index
    %c4_87 = arith.constant 4 : index
    %c0_88 = arith.constant 0 : index
    %c0_89 = arith.constant 0 : index
    %83 = vector.load %arg5[%c0_86, %c4_87, %c0_88, %c0_89] : memref<1x10x2x128xf32, #tpu.memory_space<vmem>>, vector<1x1x2x128xf32>
    %84 = vector.shape_cast %83 : vector<1x1x2x128xf32> to vector<2x128xf32>
    %85 = vector.shape_cast %82 : vector<2x128xf32> to vector<1x1x2x128xf32>
    tpu.vector_store %arg5[%c0_86, %c4_87, %c0_88, %c0_89], %85 {strides = array<i32>} : memref<1x10x2x128xf32, #tpu.memory_space<vmem>>, vector<1x1x2x128xf32>,
    %86 = arith.addf %74, %82 : vector<2x128xf32>
    %c4_90 = arith.constant 4 : index
    %87 = memref.load %arg3[%c4_90] : memref<10xf32, #tpu.memory_space<smem>>
    %88 = vector.broadcast %87 : f32 to vector<2x128xf32>
    %89 = arith.mulf %82, %88 : vector<2x128xf32>
    %90 = arith.addf %78, %89 : vector<2x128xf32>
    %c0_91 = arith.constant 0 : index
    %c0_92 = arith.constant 0 : index
    %c5_93 = arith.constant 5 : index
    %c0_94 = arith.constant 0 : index
    %c0_95 = arith.constant 0 : index
    %91 = vector.load %arg2[%c0_91, %c0_92, %c5_93, %c0_94, %c0_95] : memref<1x1x10x2x128xf32, #tpu.memory_space<vmem>>, vector<1x1x1x2x128xf32>
    %92 = vector.shape_cast %91 : vector<1x1x1x2x128xf32> to vector<2x128xf32>
    %93 = arith.subf %92, %28 : vector<2x128xf32>
    %94 = math.exp %93 : vector<2x128xf32>
    %c0_96 = arith.constant 0 : index
    %c5_97 = arith.constant 5 : index
    %c0_98 = arith.constant 0 : index
    %c0_99 = arith.constant 0 : index
    %95 = vector.load %arg5[%c0_96, %c5_97, %c0_98, %c0_99] : memref<1x10x2x128xf32, #tpu.memory_space<vmem>>, vector<1x1x2x128xf32>
    %96 = vector.shape_cast %95 : vector<1x1x2x128xf32> to vector<2x128xf32>
    %97 = vector.shape_cast %94 : vector<2x128xf32> to vector<1x1x2x128xf32>
    tpu.vector_store %arg5[%c0_96, %c5_97, %c0_98, %c0_99], %97 {strides = array<i32>} : memref<1x10x2x128xf32, #tpu.memory_space<vmem>>, vector<1x1x2x128xf32>,
    %98 = arith.addf %86, %94 : vector<2x128xf32>
    %c5_100 = arith.constant 5 : index
    %99 = memref.load %arg3[%c5_100] : memref<10xf32, #tpu.memory_space<smem>>
    %100 = vector.broadcast %99 : f32 to vector<2x128xf32>
    %101 = arith.mulf %94, %100 : vector<2x128xf32>
    %102 = arith.addf %90, %101 : vector<2x128xf32>
    %c0_101 = arith.constant 0 : index
    %c0_102 = arith.constant 0 : index
    %c6_103 = arith.constant 6 : index
    %c0_104 = arith.constant 0 : index
    %c0_105 = arith.constant 0 : index
    %103 = vector.load %arg2[%c0_101, %c0_102, %c6_103, %c0_104, %c0_105] : memref<1x1x10x2x128xf32, #tpu.memory_space<vmem>>, vector<1x1x1x2x128xf32>
    %104 = vector.shape_cast %103 : vector<1x1x1x2x128xf32> to vector<2x128xf32>
    %105 = arith.subf %104, %28 : vector<2x128xf32>
    %106 = math.exp %105 : vector<2x128xf32>
    %c0_106 = arith.constant 0 : index
    %c6_107 = arith.constant 6 : index
    %c0_108 = arith.constant 0 : index
    %c0_109 = arith.constant 0 : index
    %107 = vector.load %arg5[%c0_106, %c6_107, %c0_108, %c0_109] : memref<1x10x2x128xf32, #tpu.memory_space<vmem>>, vector<1x1x2x128xf32>
    %108 = vector.shape_cast %107 : vector<1x1x2x128xf32> to vector<2x128xf32>
    %109 = vector.shape_cast %106 : vector<2x128xf32> to vector<1x1x2x128xf32>
    tpu.vector_store %arg5[%c0_106, %c6_107, %c0_108, %c0_109], %109 {strides = array<i32>} : memref<1x10x2x128xf32, #tpu.memory_space<vmem>>, vector<1x1x2x128xf32>,
    %110 = arith.addf %98, %106 : vector<2x128xf32>
    %c6_110 = arith.constant 6 : index
    %111 = memref.load %arg3[%c6_110] : memref<10xf32, #tpu.memory_space<smem>>
    %112 = vector.broadcast %111 : f32 to vector<2x128xf32>
    %113 = arith.mulf %106, %112 : vector<2x128xf32>
    %114 = arith.addf %102, %113 : vector<2x128xf32>
    %c0_111 = arith.constant 0 : index
    %c0_112 = arith.constant 0 : index
    %c7_113 = arith.constant 7 : index
    %c0_114 = arith.constant 0 : index
    %c0_115 = arith.constant 0 : index
    %115 = vector.load %arg2[%c0_111, %c0_112, %c7_113, %c0_114, %c0_115] : memref<1x1x10x2x128xf32, #tpu.memory_space<vmem>>, vector<1x1x1x2x128xf32>
    %116 = vector.shape_cast %115 : vector<1x1x1x2x128xf32> to vector<2x128xf32>
    %117 = arith.subf %116, %28 : vector<2x128xf32>
    %118 = math.exp %117 : vector<2x128xf32>
    %c0_116 = arith.constant 0 : index
    %c7_117 = arith.constant 7 : index
    %c0_118 = arith.constant 0 : index
    %c0_119 = arith.constant 0 : index
    %119 = vector.load %arg5[%c0_116, %c7_117, %c0_118, %c0_119] : memref<1x10x2x128xf32, #tpu.memory_space<vmem>>, vector<1x1x2x128xf32>
    %120 = vector.shape_cast %119 : vector<1x1x2x128xf32> to vector<2x128xf32>
    %121 = vector.shape_cast %118 : vector<2x128xf32> to vector<1x1x2x128xf32>
    tpu.vector_store %arg5[%c0_116, %c7_117, %c0_118, %c0_119], %121 {strides = array<i32>} : memref<1x10x2x128xf32, #tpu.memory_space<vmem>>, vector<1x1x2x128xf32>,
    %122 = arith.addf %110, %118 : vector<2x128xf32>
    %c7_120 = arith.constant 7 : index
    %123 = memref.load %arg3[%c7_120] : memref<10xf32, #tpu.memory_space<smem>>
    %124 = vector.broadcast %123 : f32 to vector<2x128xf32>
    %125 = arith.mulf %118, %124 : vector<2x128xf32>
    %126 = arith.addf %114, %125 : vector<2x128xf32>
    %c0_121 = arith.constant 0 : index
    %c0_122 = arith.constant 0 : index
    %c8_123 = arith.constant 8 : index
    %c0_124 = arith.constant 0 : index
    %c0_125 = arith.constant 0 : index
    %127 = vector.load %arg2[%c0_121, %c0_122, %c8_123, %c0_124, %c0_125] : memref<1x1x10x2x128xf32, #tpu.memory_space<vmem>>, vector<1x1x1x2x128xf32>
    %128 = vector.shape_cast %127 : vector<1x1x1x2x128xf32> to vector<2x128xf32>
    %129 = arith.subf %128, %28 : vector<2x128xf32>
    %130 = math.exp %129 : vector<2x128xf32>
    %c0_126 = arith.constant 0 : index
    %c8_127 = arith.constant 8 : index
    %c0_128 = arith.constant 0 : index
    %c0_129 = arith.constant 0 : index
    %131 = vector.load %arg5[%c0_126, %c8_127, %c0_128, %c0_129] : memref<1x10x2x128xf32, #tpu.memory_space<vmem>>, vector<1x1x2x128xf32>
    %132 = vector.shape_cast %131 : vector<1x1x2x128xf32> to vector<2x128xf32>
    %133 = vector.shape_cast %130 : vector<2x128xf32> to vector<1x1x2x128xf32>
    tpu.vector_store %arg5[%c0_126, %c8_127, %c0_128, %c0_129], %133 {strides = array<i32>} : memref<1x10x2x128xf32, #tpu.memory_space<vmem>>, vector<1x1x2x128xf32>,
    %134 = arith.addf %122, %130 : vector<2x128xf32>
    %c8_130 = arith.constant 8 : index
    %135 = memref.load %arg3[%c8_130] : memref<10xf32, #tpu.memory_space<smem>>
    %136 = vector.broadcast %135 : f32 to vector<2x128xf32>
    %137 = arith.mulf %130, %136 : vector<2x128xf32>
    %138 = arith.addf %126, %137 : vector<2x128xf32>
    %c0_131 = arith.constant 0 : index
    %c0_132 = arith.constant 0 : index
    %c9_133 = arith.constant 9 : index
    %c0_134 = arith.constant 0 : index
    %c0_135 = arith.constant 0 : index
    %139 = vector.load %arg2[%c0_131, %c0_132, %c9_133, %c0_134, %c0_135] : memref<1x1x10x2x128xf32, #tpu.memory_space<vmem>>, vector<1x1x1x2x128xf32>
    %140 = vector.shape_cast %139 : vector<1x1x1x2x128xf32> to vector<2x128xf32>
    %141 = arith.subf %140, %28 : vector<2x128xf32>
    %142 = math.exp %141 : vector<2x128xf32>
    %c0_136 = arith.constant 0 : index
    %c9_137 = arith.constant 9 : index
    %c0_138 = arith.constant 0 : index
    %c0_139 = arith.constant 0 : index
    %143 = vector.load %arg5[%c0_136, %c9_137, %c0_138, %c0_139] : memref<1x10x2x128xf32, #tpu.memory_space<vmem>>, vector<1x1x2x128xf32>
    %144 = vector.shape_cast %143 : vector<1x1x2x128xf32> to vector<2x128xf32>
    %145 = vector.shape_cast %142 : vector<2x128xf32> to vector<1x1x2x128xf32>
    tpu.vector_store %arg5[%c0_136, %c9_137, %c0_138, %c0_139], %145 {strides = array<i32>} : memref<1x10x2x128xf32, #tpu.memory_space<vmem>>, vector<1x1x2x128xf32>,
    %146 = arith.addf %134, %142 : vector<2x128xf32>
    %c9_140 = arith.constant 9 : index
    %147 = memref.load %arg3[%c9_140] : memref<10xf32, #tpu.memory_space<smem>>
    %148 = vector.broadcast %147 : f32 to vector<2x128xf32>
    %149 = arith.mulf %142, %148 : vector<2x128xf32>
    %150 = arith.addf %138, %149 : vector<2x128xf32>
    %151 = tpu.reciprocal %146 : vector<2x128xf32> -> vector<2x128xf32>
    %c0_141 = arith.constant 0 : index
    %c0_142 = arith.constant 0 : index
    %c0_143 = arith.constant 0 : index
    %c0_144 = arith.constant 0 : index
    %152 = vector.load %arg5[%c0_141, %c0_142, %c0_143, %c0_144] : memref<1x10x2x128xf32, #tpu.memory_space<vmem>>, vector<1x1x2x128xf32>
    %153 = vector.shape_cast %152 : vector<1x1x2x128xf32> to vector<2x128xf32>
    %154 = arith.mulf %153, %151 : vector<2x128xf32>
    %c0_145 = arith.constant 0 : index
    %c0_146 = arith.constant 0 : index
    %c0_147 = arith.constant 0 : index
    %c0_148 = arith.constant 0 : index
    %155 = vector.load %arg5[%c0_145, %c0_146, %c0_147, %c0_148] : memref<1x10x2x128xf32, #tpu.memory_space<vmem>>, vector<1x1x2x128xf32>
    %156 = vector.shape_cast %155 : vector<1x1x2x128xf32> to vector<2x128xf32>
    %157 = vector.shape_cast %154 : vector<2x128xf32> to vector<1x1x2x128xf32>
    tpu.vector_store %arg5[%c0_145, %c0_146, %c0_147, %c0_148], %157 {strides = array<i32>} : memref<1x10x2x128xf32, #tpu.memory_space<vmem>>, vector<1x1x2x128xf32>,
    %c0_149 = arith.constant 0 : index
    %c1_150 = arith.constant 1 : index
    %c0_151 = arith.constant 0 : index
    %c0_152 = arith.constant 0 : index
    %158 = vector.load %arg5[%c0_149, %c1_150, %c0_151, %c0_152] : memref<1x10x2x128xf32, #tpu.memory_space<vmem>>, vector<1x1x2x128xf32>
    %159 = vector.shape_cast %158 : vector<1x1x2x128xf32> to vector<2x128xf32>
    %160 = arith.mulf %159, %151 : vector<2x128xf32>
    %c0_153 = arith.constant 0 : index
    %c1_154 = arith.constant 1 : index
    %c0_155 = arith.constant 0 : index
    %c0_156 = arith.constant 0 : index
    %161 = vector.load %arg5[%c0_153, %c1_154, %c0_155, %c0_156] : memref<1x10x2x128xf32, #tpu.memory_space<vmem>>, vector<1x1x2x128xf32>
    %162 = vector.shape_cast %161 : vector<1x1x2x128xf32> to vector<2x128xf32>
    %163 = vector.shape_cast %160 : vector<2x128xf32> to vector<1x1x2x128xf32>
    tpu.vector_store %arg5[%c0_153, %c1_154, %c0_155, %c0_156], %163 {strides = array<i32>} : memref<1x10x2x128xf32, #tpu.memory_space<vmem>>, vector<1x1x2x128xf32>,
    %c0_157 = arith.constant 0 : index
    %c2_158 = arith.constant 2 : index
    %c0_159 = arith.constant 0 : index
    %c0_160 = arith.constant 0 : index
    %164 = vector.load %arg5[%c0_157, %c2_158, %c0_159, %c0_160] : memref<1x10x2x128xf32, #tpu.memory_space<vmem>>, vector<1x1x2x128xf32>
    %165 = vector.shape_cast %164 : vector<1x1x2x128xf32> to vector<2x128xf32>
    %166 = arith.mulf %165, %151 : vector<2x128xf32>
    %c0_161 = arith.constant 0 : index
    %c2_162 = arith.constant 2 : index
    %c0_163 = arith.constant 0 : index
    %c0_164 = arith.constant 0 : index
    %167 = vector.load %arg5[%c0_161, %c2_162, %c0_163, %c0_164] : memref<1x10x2x128xf32, #tpu.memory_space<vmem>>, vector<1x1x2x128xf32>
    %168 = vector.shape_cast %167 : vector<1x1x2x128xf32> to vector<2x128xf32>
    %169 = vector.shape_cast %166 : vector<2x128xf32> to vector<1x1x2x128xf32>
    tpu.vector_store %arg5[%c0_161, %c2_162, %c0_163, %c0_164], %169 {strides = array<i32>} : memref<1x10x2x128xf32, #tpu.memory_space<vmem>>, vector<1x1x2x128xf32>,
    %c0_165 = arith.constant 0 : index
    %c3_166 = arith.constant 3 : index
    %c0_167 = arith.constant 0 : index
    %c0_168 = arith.constant 0 : index
    %170 = vector.load %arg5[%c0_165, %c3_166, %c0_167, %c0_168] : memref<1x10x2x128xf32, #tpu.memory_space<vmem>>, vector<1x1x2x128xf32>
    %171 = vector.shape_cast %170 : vector<1x1x2x128xf32> to vector<2x128xf32>
    %172 = arith.mulf %171, %151 : vector<2x128xf32>
    %c0_169 = arith.constant 0 : index
    %c3_170 = arith.constant 3 : index
    %c0_171 = arith.constant 0 : index
    %c0_172 = arith.constant 0 : index
    %173 = vector.load %arg5[%c0_169, %c3_170, %c0_171, %c0_172] : memref<1x10x2x128xf32, #tpu.memory_space<vmem>>, vector<1x1x2x128xf32>
    %174 = vector.shape_cast %173 : vector<1x1x2x128xf32> to vector<2x128xf32>
    %175 = vector.shape_cast %172 : vector<2x128xf32> to vector<1x1x2x128xf32>
    tpu.vector_store %arg5[%c0_169, %c3_170, %c0_171, %c0_172], %175 {strides = array<i32>} : memref<1x10x2x128xf32, #tpu.memory_space<vmem>>, vector<1x1x2x128xf32>,
    %c0_173 = arith.constant 0 : index
    %c4_174 = arith.constant 4 : index
    %c0_175 = arith.constant 0 : index
    %c0_176 = arith.constant 0 : index
    %176 = vector.load %arg5[%c0_173, %c4_174, %c0_175, %c0_176] : memref<1x10x2x128xf32, #tpu.memory_space<vmem>>, vector<1x1x2x128xf32>
    %177 = vector.shape_cast %176 : vector<1x1x2x128xf32> to vector<2x128xf32>
    %178 = arith.mulf %177, %151 : vector<2x128xf32>
    %c0_177 = arith.constant 0 : index
    %c4_178 = arith.constant 4 : index
    %c0_179 = arith.constant 0 : index
    %c0_180 = arith.constant 0 : index
    %179 = vector.load %arg5[%c0_177, %c4_178, %c0_179, %c0_180] : memref<1x10x2x128xf32, #tpu.memory_space<vmem>>, vector<1x1x2x128xf32>
    %180 = vector.shape_cast %179 : vector<1x1x2x128xf32> to vector<2x128xf32>
    %181 = vector.shape_cast %178 : vector<2x128xf32> to vector<1x1x2x128xf32>
    tpu.vector_store %arg5[%c0_177, %c4_178, %c0_179, %c0_180], %181 {strides = array<i32>} : memref<1x10x2x128xf32, #tpu.memory_space<vmem>>, vector<1x1x2x128xf32>,
    %c0_181 = arith.constant 0 : index
    %c5_182 = arith.constant 5 : index
    %c0_183 = arith.constant 0 : index
    %c0_184 = arith.constant 0 : index
    %182 = vector.load %arg5[%c0_181, %c5_182, %c0_183, %c0_184] : memref<1x10x2x128xf32, #tpu.memory_space<vmem>>, vector<1x1x2x128xf32>
    %183 = vector.shape_cast %182 : vector<1x1x2x128xf32> to vector<2x128xf32>
    %184 = arith.mulf %183, %151 : vector<2x128xf32>
    %c0_185 = arith.constant 0 : index
    %c5_186 = arith.constant 5 : index
    %c0_187 = arith.constant 0 : index
    %c0_188 = arith.constant 0 : index
    %185 = vector.load %arg5[%c0_185, %c5_186, %c0_187, %c0_188] : memref<1x10x2x128xf32, #tpu.memory_space<vmem>>, vector<1x1x2x128xf32>
    %186 = vector.shape_cast %185 : vector<1x1x2x128xf32> to vector<2x128xf32>
    %187 = vector.shape_cast %184 : vector<2x128xf32> to vector<1x1x2x128xf32>
    tpu.vector_store %arg5[%c0_185, %c5_186, %c0_187, %c0_188], %187 {strides = array<i32>} : memref<1x10x2x128xf32, #tpu.memory_space<vmem>>, vector<1x1x2x128xf32>,
    %c0_189 = arith.constant 0 : index
    %c6_190 = arith.constant 6 : index
    %c0_191 = arith.constant 0 : index
    %c0_192 = arith.constant 0 : index
    %188 = vector.load %arg5[%c0_189, %c6_190, %c0_191, %c0_192] : memref<1x10x2x128xf32, #tpu.memory_space<vmem>>, vector<1x1x2x128xf32>
    %189 = vector.shape_cast %188 : vector<1x1x2x128xf32> to vector<2x128xf32>
    %190 = arith.mulf %189, %151 : vector<2x128xf32>
    %c0_193 = arith.constant 0 : index
    %c6_194 = arith.constant 6 : index
    %c0_195 = arith.constant 0 : index
    %c0_196 = arith.constant 0 : index
    %191 = vector.load %arg5[%c0_193, %c6_194, %c0_195, %c0_196] : memref<1x10x2x128xf32, #tpu.memory_space<vmem>>, vector<1x1x2x128xf32>
    %192 = vector.shape_cast %191 : vector<1x1x2x128xf32> to vector<2x128xf32>
    %193 = vector.shape_cast %190 : vector<2x128xf32> to vector<1x1x2x128xf32>
    tpu.vector_store %arg5[%c0_193, %c6_194, %c0_195, %c0_196], %193 {strides = array<i32>} : memref<1x10x2x128xf32, #tpu.memory_space<vmem>>, vector<1x1x2x128xf32>,
    %c0_197 = arith.constant 0 : index
    %c7_198 = arith.constant 7 : index
    %c0_199 = arith.constant 0 : index
    %c0_200 = arith.constant 0 : index
    %194 = vector.load %arg5[%c0_197, %c7_198, %c0_199, %c0_200] : memref<1x10x2x128xf32, #tpu.memory_space<vmem>>, vector<1x1x2x128xf32>
    %195 = vector.shape_cast %194 : vector<1x1x2x128xf32> to vector<2x128xf32>
    %196 = arith.mulf %195, %151 : vector<2x128xf32>
    %c0_201 = arith.constant 0 : index
    %c7_202 = arith.constant 7 : index
    %c0_203 = arith.constant 0 : index
    %c0_204 = arith.constant 0 : index
    %197 = vector.load %arg5[%c0_201, %c7_202, %c0_203, %c0_204] : memref<1x10x2x128xf32, #tpu.memory_space<vmem>>, vector<1x1x2x128xf32>
    %198 = vector.shape_cast %197 : vector<1x1x2x128xf32> to vector<2x128xf32>
    %199 = vector.shape_cast %196 : vector<2x128xf32> to vector<1x1x2x128xf32>
    tpu.vector_store %arg5[%c0_201, %c7_202, %c0_203, %c0_204], %199 {strides = array<i32>} : memref<1x10x2x128xf32, #tpu.memory_space<vmem>>, vector<1x1x2x128xf32>,
    %c0_205 = arith.constant 0 : index
    %c8_206 = arith.constant 8 : index
    %c0_207 = arith.constant 0 : index
    %c0_208 = arith.constant 0 : index
    %200 = vector.load %arg5[%c0_205, %c8_206, %c0_207, %c0_208] : memref<1x10x2x128xf32, #tpu.memory_space<vmem>>, vector<1x1x2x128xf32>
    %201 = vector.shape_cast %200 : vector<1x1x2x128xf32> to vector<2x128xf32>
    %202 = arith.mulf %201, %151 : vector<2x128xf32>
    %c0_209 = arith.constant 0 : index
    %c8_210 = arith.constant 8 : index
    %c0_211 = arith.constant 0 : index
    %c0_212 = arith.constant 0 : index
    %203 = vector.load %arg5[%c0_209, %c8_210, %c0_211, %c0_212] : memref<1x10x2x128xf32, #tpu.memory_space<vmem>>, vector<1x1x2x128xf32>
    %204 = vector.shape_cast %203 : vector<1x1x2x128xf32> to vector<2x128xf32>
    %205 = vector.shape_cast %202 : vector<2x128xf32> to vector<1x1x2x128xf32>
    tpu.vector_store %arg5[%c0_209, %c8_210, %c0_211, %c0_212], %205 {strides = array<i32>} : memref<1x10x2x128xf32, #tpu.memory_space<vmem>>, vector<1x1x2x128xf32>,
    %c0_213 = arith.constant 0 : index
    %c9_214 = arith.constant 9 : index
    %c0_215 = arith.constant 0 : index
    %c0_216 = arith.constant 0 : index
    %206 = vector.load %arg5[%c0_213, %c9_214, %c0_215, %c0_216] : memref<1x10x2x128xf32, #tpu.memory_space<vmem>>, vector<1x1x2x128xf32>
    %207 = vector.shape_cast %206 : vector<1x1x2x128xf32> to vector<2x128xf32>
    %208 = arith.mulf %207, %151 : vector<2x128xf32>
    %c0_217 = arith.constant 0 : index
    %c9_218 = arith.constant 9 : index
    %c0_219 = arith.constant 0 : index
    %c0_220 = arith.constant 0 : index
    %209 = vector.load %arg5[%c0_217, %c9_218, %c0_219, %c0_220] : memref<1x10x2x128xf32, #tpu.memory_space<vmem>>, vector<1x1x2x128xf32>
    %210 = vector.shape_cast %209 : vector<1x1x2x128xf32> to vector<2x128xf32>
    %211 = vector.shape_cast %208 : vector<2x128xf32> to vector<1x1x2x128xf32>
    tpu.vector_store %arg5[%c0_217, %c9_218, %c0_219, %c0_220], %211 {strides = array<i32>} : memref<1x10x2x128xf32, #tpu.memory_space<vmem>>, vector<1x1x2x128xf32>,
    %212 = arith.mulf %150, %151 : vector<2x128xf32>
    %c0_221 = arith.constant 0 : index
    %c0_222 = arith.constant 0 : index
    %c0_223 = arith.constant 0 : index
    %c0_224 = arith.constant 0 : index
    %213 = vector.load %arg4[%c0_221, %c0_222, %c0_223, %c0_224] : memref<1x1x2x128xf32, #tpu.memory_space<vmem>>, vector<1x1x2x128xf32>
    %214 = vector.shape_cast %213 : vector<1x1x2x128xf32> to vector<2x128xf32>
    %215 = vector.shape_cast %212 : vector<2x128xf32> to vector<1x1x2x128xf32>
    tpu.vector_store %arg4[%c0_221, %c0_222, %c0_223, %c0_224], %215 {strides = array<i32>} : memref<1x1x2x128xf32, #tpu.memory_space<vmem>>, vector<1x1x2x128xf32>,
    return
  }
  func.func @transform_0(%arg0: i32, %arg1: i32) -> (i32, i32, i32, i32, i32) {
    %c0_i32 = arith.constant 0 : i32
    %c0_i32_0 = arith.constant 0 : i32
    %c0_i32_1 = arith.constant 0 : i32
    %c0_i32_2 = arith.constant 0 : i32
    return %arg0, %c0_i32, %c0_i32_0, %arg1, %c0_i32_1 : i32, i32, i32, i32, i32
  }
  func.func @transform_1(%arg0: i32, %arg1: i32) -> i32 {
    %c0_i32 = arith.constant 0 : i32
    %c0_i32_0 = arith.constant 0 : i32
    return %c0_i32 : i32
  }
  func.func @transform_2(%arg0: i32, %arg1: i32) -> (i32, i32, i32, i32) {
    %c0_i32 = arith.constant 0 : i32
    %c0_i32_0 = arith.constant 0 : i32
    %c0_i32_1 = arith.constant 0 : i32
    return %arg0, %c0_i32, %arg1, %c0_i32_0 : i32, i32, i32, i32
  }
  func.func @transform_3(%arg0: i32, %arg1: i32) -> (i32, i32, i32, i32) {
    %c0_i32 = arith.constant 0 : i32
    %c0_i32_0 = arith.constant 0 : i32
    %c0_i32_1 = arith.constant 0 : i32
    return %arg0, %c0_i32, %arg1, %c0_i32_0 : i32, i32, i32, i32
  }
}

</mosaic_0001>

<bundles_post_ra>
// kernel: tpu_custom_call.1
= control target key start
LH: loop header
LB: loop body
LE: loop exit
PB: predicated region body
PF: predicated region fallthrough
CT: control target
= control target key end

     0   :  { %9 = vsyncpa [#allocation3], 0  ;;  %s1257_s0 = inlined_call_operand.hbm [shape: f32[2,4,10,2,128], index: 0, kind: input, shape index: {}]   ;;  %s1258_s1 = inlined_call_operand.vmem [shape: f32[10], index: 1, kind: input, shape index: {}]   ;;  %s1259_s2 = inlined_call_operand.hbm [shape: f32[2,1,2,128], index: 2, kind: output, shape index: {0}]   ;;  %s1260_s3 = inlined_call_operand.hbm [shape: f32[2,10,2,128], index: 3, kind: output, shape index: {1}]  }
   0x1   :  { %11 = vsyncpa [#allocation3 + $0x1], 0 }
   0x2   :  { %12 = vsyncpa [#allocation5], 0 }
   0x3   :  { %13 = vsyncpa [#allocation4], 0 }
   0x4   :  { %15 = vsyncpa [#allocation4 + $0x1], 0 }
   0x5   :  { %16 = vsyncpa [#allocation9], 0 }
   0x6   :  { %18 = vsyncpa [#allocation9 + $0x1], 0  ;;  %s935_s12 = smov 0   ;;  %s937_s13 = smov 0  }
   0x7   :  { %s939_s14 = smov 0   ;;  %s941_s15 = smov 0  }
   0x8   :  { %s943_s16 = smov 0   ;;  %s945_s17 = smov 0  }
   0x9 LB: > { %s566_s18 = sadd.s32 4294967295, %s905_s17   ;;  %s567_s19 = sadd.s32 4294967294, %s905_s17   ;;  %s905_s17 = sphi %s945_s17, %s24_s17   ;;  %s901_s16 = sphi %s943_s16, %s1283_s16   ;;  %s897_s15 = sphi %s941_s15, %s1282_s15   ;;  %s893_s14 = sphi %s939_s14, %s1281_s14   ;;  %s889_s13 = sphi %s937_s13, %s1280_s13   ;;  %s885_s12 = sphi %s935_s12, %s1279_s12  }
   0xa   : > { %s45_s20 = sadd.s32 1, %s893_s14  ;;  %p52_p0 = scmp.ne.s32.totalorder %s893_s14, %s889_s13 }
   0xb   : > { %p53_p1 = scmp.eq.s32.totalorder %s905_s17, 0  ;;  %p58_p2 = scmp.ne.s32.totalorder %s889_s13, %s885_s12 }
   0xc   : > { %p973_p3 = scmp.eq.s32.totalorder %s566_s18, 0  ;;  %p105_p4 = scmp.eq.s32.totalorder %s566_s18, 1 }
   0xd   : > { %p977_p5 = por %p53_p1, %p52_p0  ;;  %p111_p6 = scmp.eq.s32.totalorder %s567_s19, 1 }
   0xe   : > { %s1265_s21 = scalar_select %p973_p3, 1, 0 }
   0xf   : > { %p983_p7 = por %p973_p3, %p58_p2  ;;  %p987_p8 = por %p105_p4, %p52_p0 }
  0x10   : > { %p991_p9 = por %p111_p6, %p58_p2  ;;  %p568_p10 = scmp.ge.s32.totalorder %s905_s17, 1 }
  0x11   : > { %s1267_s23 = scalar_select %p983_p7, 1, 0 }
  0x12   : > { %s1268_s24 = scalar_select %p987_p8, 1, 0 }
  0x13   : > { %s1269_s25 = scalar_select %p991_p9, 1, 0 }
  0x14   : > { %p146_p11 = scmp.lt.s32.totalorder %s905_s17, 3  ;;  %s159_s28 = sshll.u32 %s1258_s1, 4  ;;  %s160_s28 = int_to_ptr.vmem [resolvable:$true] %s159_s28 }
  0x15   : > { %p664_p0 = scmp.lt.s32.totalorder %s905_s17, 2  ;;  %s36_s5 = sadd.s32 1, %s901_s16 }
  0x16   : > { %p1000_p12 = pnand %p568_p10, %p146_p11  ;;  %p1021_p6 = scmp.ge.s32.totalorder %s36_s5, 2 }
  0x17   : > { %p1010_p2 = pnand %p664_p0, %p977_p5  ;;  %s170_s7 = sand.u32 1, %s893_s14  }
  0x18   : > { %p648_p1 = pneg %p1000_p12  ;;  %s742_s8 = scalar_lea.vmem %s160_s28, 16 }
  0x19   : > { %p743_p10 = scmp.ne.s32.totalorder %s160_s28, %s742_s8  ;;  %p750_p13 = scmp.lt.s32.totalorder %s160_s28, %s160_s28 }
  0x1a   : > { %p1016_p4 = pnand %p648_p1, %p973_p3  ;;  %p751_p9 = scmp.lt.s32.totalorder %s742_s8, %s742_s8 }
  0x1c   : > { %p744_p11 = pneg %p1016_p4  ;;  %p752_p8 = por %p751_p9, %p750_p13 }
  0x1e   : > { %p745_p5 = pnand %p744_p11, %p743_p10 }
  0x20   : > { %p746_p0 = pneg %p745_p5 }
  0x22   : > { %p753_p1 = pnand %p752_p8, %p746_p0 }
  0x24   : > { %756 = shalt.err (!%p753_p1)
}
  0x25   : > { %s907_s9 = smov [#allocation6]   ;;  %s1285_s5 = smov (%p1021_p6, %s36_s5), 0 }
  0x26   : > { %651 = dma.vmem_to_smem (!%p1016_p4), %s160_s28, 16, %s907_s9, [#allocation5]  }
  0x27   : > { %s634_s10 = smul.u32 20, %s170_s7  ;;  %s40_s11 = ssub.s32 %s901_s16, %s1285_s5 }
  0x28   : > { %s635_s18 = smul.u32 1280, %s901_s16  ;;  %p43_p8 = scmp.eq.s32.totalorder %s40_s11, 0 }
  0x29   : > { %s174_s27 = scalar_lea.vmem [#allocation2], %s634_s10  ;;  %s1049_s6 = scalar_lea.sflag [#allocation3], %s170_s7 }
  0x2a   : > { %s1040_s26 = scalar_lea.hbm %s1257_s0, %s635_s18  ;;  %s182_s4 = sshll.u32 %s174_s27, 4  ;;  %s1047_s4 = int_to_ptr.vmem [resolvable:$true] %s182_s4 }
  0x2b   : > { %s1045_s28 = scalar_select %p43_p8, %s893_s14, %s45_s20  }
  0x2c   : > { %s757_s8 = scalar_lea.hbm %s1040_s26, 320  ;;  %p759_p13 = pneg %p1010_p2 }
  0x2d   : > { %p758_p9 = scmp.ne.s32.totalorder %s1040_s26, %s757_s8  ;;  %s762_s10 = scalar_lea.hbm %s1257_s0, 2560 }
  0x2e   : > { %p763_p10 = scmp.lt.u32.totalorder %s1040_s26, %s1257_s0  ;;  %p764_p11 = scmp.lt.u32.totalorder %s762_s10, %s757_s8 }
  0x2f   : > { %p760_p4 = pnand %p759_p13, %p758_p9  ;;  %p766_p0 = scmp.lt.u32.totalorder %s757_s8, %s1040_s26 }
  0x30   : > { %p765_p5 = por %p764_p11, %p763_p10 }
  0x31   : > { %p761_p6 = pneg %p760_p4 }
  0x32   : > { %p767_p1 = por %p766_p0, %p765_p5 }
  0x34   : > { %p768_p8 = pnand %p767_p1, %p761_p6 }
  0x36   : > { %771 = shalt.err (!%p768_p8)
}
  0x37   : > { %s772_s20 = scalar_lea.vmem %s1047_s4, 320  ;;  %s908_s7 = smov [#allocation2]  }
  0x38   : > { %p773_p9 = scmp.ne.s32.totalorder %s1047_s4, %s772_s20  ;;  %s777_s22 = sshll.u32 %s908_s7, 4  ;;  %s778_s22 = int_to_ptr.vmem [resolvable:$false] %s777_s22 }
  0x39   : > { %s779_s27 = scalar_lea.vmem %s778_s22, 640  ;;  %p780_p7 = scmp.lt.s32.totalorder %s1047_s4, %s778_s22 }
  0x3a   : > { %p775_p4 = pnand %p773_p9, %p759_p13  ;;  %p781_p10 = scmp.lt.s32.totalorder %s779_s27, %s772_s20 }
  0x3c   : > { %p776_p3 = pneg %p775_p4  ;;  %p782_p11 = por %p781_p10, %p780_p7 }
  0x3e   : > { %p783_p5 = pnand %p782_p11, %p776_p3 }
  0x40   : > { %786 = shalt.err (!%p783_p5)
}
  0x41   : > { %s909_s8 = smov 32   ;;  %s910_s9 = smov 2  }
  0x42   : > { %655 = dma.hbm_to_vmem [thread:$0]  (!%p1010_p2), %s1040_s26, 320, %s1047_s4, %s1049_s6, %s909_s8, %s909_s8, %s910_s9  }
  0x43   : > { %194 = sbr.rel (%p1000_p12) target bundleno = 189 (0xbd), region = 28  ;;  %s1080_s11 = sand.u32 (!%p1000_p12), 1, %s889_s13  }
  0x44   : > { %s636_s10 = smul.u32 (!%p1000_p12), 20, %s1080_s11  ;;  %s197_s18 = scalar_lea.sflag (!%p1000_p12), [#allocation3], %s1080_s11 }
  0x45   : > { %p1274_p3 = scmp.ne.s32.totalorder (!%p1000_p12), %s1267_s23, 0 }
  0x46   : > { %s1086_s19 = scalar_lea.vmem (!%p1000_p12), [#allocation2], %s636_s10 }
  0x4a   : > { %868 = dma.done.wait (%p1274_p3), %s197_s18, 320  }
  0x4b   : > { %870 = vsyncadd (%p1274_p3), %s197_s18, 4294966976  ;;  %p1275_p7 = scmp.ne.s32.totalorder %s1265_s21, 0 }
  0x4d   : > { %872 = dma.done.wait (%p1275_p7), [#allocation5], 16  }
  0x4e   : > { %874 = vsyncadd (%p1275_p7), [#allocation5], 4294967280 }
  0x4f   : > { %209 = sfence }
  0x50   : > { %v233_v0 = vld [vmem:[%s1086_s19] sm:$0x3]  ;;  %v575_v1 = vld [vmem:[%s1086_s19 + $0x2] sm:$0x3]  ;;  %v576_v3 = vld [vmem:[%s1086_s19 + $0x4] sm:$0x3] }
  0x51   : > { %v236_v2 = vmax.f32 %v233_v0, %v575_v1  ;;  %v577_v4 = vld [vmem:[%s1086_s19 + $0x6] sm:$0x3]  ;;  %v578_v6 = vld [vmem:[%s1086_s19 + $0x8] sm:$0x3]  ;;  %v579_v8 = vld [vmem:[%s1086_s19 + $0xa] sm:$0x3] }
  0x52   : > { %v580_v10 = vld [vmem:[%s1086_s19 + $0xc] sm:$0x3]  ;;  %v581_v12 = vld [vmem:[%s1086_s19 + $0xe] sm:$0x3]  ;;  %v582_v14 = vld [vmem:[%s1086_s19 + $0x10] sm:$0x3] }
  0x53   : > { %v239_v5 = vmax.f32 %v236_v2, %v576_v3  ;;  %v583_v16 = vld [vmem:[%s1086_s19 + $0x12] sm:$0x3]  ;;  %v584_v18 = vld [vmem:[%s1086_s19 + $0x2] sm:$0x3]  ;;  %v587_v19 = vld [vmem:[%s1086_s19 + $0x4] sm:$0x3] }
  0x54   : > { %v590_v20 = vld [vmem:[%s1086_s19 + $0x6] sm:$0x3]  ;;  %v593_v22 = vld [vmem:[%s1086_s19 + $0x8] sm:$0x3]  ;;  %v596_v23 = vld [vmem:[%s1086_s19 + $0xa] sm:$0x3] }
  0x55   : > { %v242_v7 = vmax.f32 %v239_v5, %v577_v4  ;;  %v599_v24 = vld [vmem:[%s1086_s19 + $0xc] sm:$0x3]  ;;  %v602_v29 = vld [vmem:[%s1086_s19 + $0xe] sm:$0x3]  ;;  %v605_v32 = vld [vmem:[%s1086_s19 + $0x10] sm:$0x3] }
  0x56   : > { %v608_v33 = vld [vmem:[%s1086_s19 + $0x12] sm:$0x3]  ;;  %s266_s21 = sld [smem:[#allocation6]]  ;;  %s586_s23 = sld [smem:[#allocation6 + $0x1]] }
  0x57   : > { %v245_v9 = vmax.f32 %v242_v7, %v578_v6  ;;  %s1115_s29 = sld [smem:[#allocation6 + $0x2]]  ;;  %s1117_s30 = sld [smem:[#allocation6 + $0x3]] }
  0x58   : > { %s1119_s26 = sld [smem:[#allocation6 + $0x4]]  ;;  %s1121_s4 = sld [smem:[#allocation6 + $0x5]] }
  0x59   : > { %v248_v11 = vmax.f32 %v245_v9, %v579_v8  ;;  %s1126_s6 = scalar_lea.vmem [#allocation8], %s636_s10  ;;  %s1131_s20 = sld [smem:[#allocation6 + $0x6]] }
  0x5a   : > { %s604_s7 = sld [smem:[#allocation6 + $0x7]]  ;;  %s607_s22 = sld [smem:[#allocation6 + $0x8]] }
  0x5b   : > { %v251_v13 = vmax.f32 %v248_v11, %v580_v10  ;;  %s610_s27 = sld [smem:[#allocation6 + $0x9]]  ;;  %s574_s8 = sshll.u32 %s1080_s11, 1 }
  0x5c   : > { %v267_v48 = vstv %s266_s21  ;;  %v278_v49 = vstv %s586_s23  ;;  %s1145_s9 = scalar_lea.vmem [#allocation7], %s574_s8  ;;  %s630_s18 = sshll.u32 %s897_s15, 5 }
  0x5d   : > { %v254_v15 = vmax.f32 %v251_v13, %v581_v12  ;;  %v289_v51 = vstv %s1115_s29  ;;  %v300_v54 = vstv %s1117_s30  ;;  %s422_s10 = sshll.u32 %s1145_s9, 4  ;;  %s637_s19 = smul.u32 320, %s897_s15  ;;  %s1160_s10 = int_to_ptr.vmem [resolvable:$true] %s422_s10 }
  0x5e   : > { %v311_v60 = vstv %s1119_s26  ;;  %v322_v6 = vstv %s1121_s4  ;;  %s436_s21 = sshll.u32 %s1126_s6, 4  ;;  %s1166_s30 = scalar_lea.hbm %s1259_s2, %s630_s18  ;;  %s1183_s21 = int_to_ptr.vmem [resolvable:$true] %s436_s21 }
  0x5f   : > { %v257_v17 = vmax.f32 %v254_v15, %v582_v14  ;;  %v333_v15 = vstv %s1131_s20  ;;  %s1177_s20 = scalar_lea.hbm %s1260_s3, %s637_s19  ;;  %p1276_p2 = scmp.ne.s32.totalorder %s1268_s24, 0 }
  0x60   : > { %s911_s15 = smov [#allocation7]  }
  0x61   : > { %v260_v21 = vmax.f32 %v257_v17, %v583_v16 }
  0x63   : > { %v261_v25 = vsub.f32 %v233_v0, %v260_v21  ;;  %v271_v26 = vsub.f32 %v584_v18, %v260_v21  ;;  %v282_v27 = vsub.f32 %v587_v19, %v260_v21  ;;  %v293_v28 = vsub.f32 %v590_v20, %v260_v21 }
  0x64   : > { %v304_v30 = vsub.f32 %v593_v22, %v260_v21  ;;  %v315_v31 = vsub.f32 %v596_v23, %v260_v21  ;;  %v326_v37 = vsub.f32 %v599_v24, %v260_v21  ;;  %v337_v39 = vsub.f32 %v602_v29, %v260_v21 }
  0x65   : > { %v262_v34 = vmul.f32 1.442695, %v261_v25  ;;  %v272_v35 = vmul.f32 1.442695, %v271_v26  ;;  %v283_v36 = vmul.f32 1.442695, %v282_v27  ;;  %v348_v41 = vsub.f32 %v605_v32, %v260_v21 }
  0x66   : > { %v294_v38 = vmul.f32 1.442695, %v293_v28  ;;  %v305_v40 = vmul.f32 1.442695, %v304_v30  ;;  %v316_v42 = vmul.f32 1.442695, %v315_v31  ;;  %v359_v43 = vsub.f32 %v608_v33, %v260_v21 }
  0x67   : > { %720 = vpow2.f32 %v262_v34  ;;  %v327_v44 = vmul.f32 1.442695, %v326_v37  ;;  %v338_v45 = vmul.f32 1.442695, %v337_v39  ;;  %v349_v46 = vmul.f32 1.442695, %v348_v41 }
  0x68   : > { %722 = vpow2.f32 %v272_v35  ;;  %v360_v47 = vmul.f32 1.442695, %v359_v43  ;;  %v344_v20 = vstv %s604_s7  ;;  %v355_v25 = vstv %s607_s22  ;;  %s403_s7 = scalar_lea.sflag [#allocation4], %s1080_s11  ;;  %s787_s22 = scalar_lea.vmem %s1160_s10, 32 }
  0x69   : > { %724 = vpow2.f32 %v283_v36  ;;  %v366_v28 = vstv %s610_s27  ;;  %p788_p12 = scmp.ne.s32.totalorder %s1160_s10, %s787_s22  ;;  %s791_s27 = sshll.u32 %s911_s15, 4  ;;  %s792_s27 = int_to_ptr.vmem [resolvable:$false] %s791_s27 }
  0x6a   : > { %726 = vpow2.f32 %v294_v38  ;;  %s793_s8 = scalar_lea.vmem %s792_s27, 64  ;;  %p794_p0 = scmp.lt.s32.totalorder %s1160_s10, %s792_s27 }
  0x6b   : > { %728 = vpow2.f32 %v305_v40  ;;  %p789_p13 = pnand %p788_p12, %p1276_p2  ;;  %p795_p1 = scmp.lt.s32.totalorder %s793_s8, %s787_s22 }
  0x6c   : > { %730 = vpow2.f32 %v316_v42 }
  0x6d   : > { %732 = vpow2.f32 %v327_v44  ;;  %p790_p6 = pneg %p789_p13  ;;  %p796_p8 = por %p795_p1, %p794_p0 }
  0x6e   : > { %734 = vpow2.f32 %v338_v45 }
  0x6f   : > { %736 = vpow2.f32 %v349_v46  ;;  %p797_p9 = pnand %p796_p8, %p790_p6 }
  0x70   : > { %738 = vpow2.f32 %v360_v47 }
  0x71   : > { %v721_v50 = vpop.eup %720 }
  0x72   : > { %v723_v52 = vpop.eup %722  ;;  %264 = vst [vmem:[%s1126_s6] sm:$0x3] %v721_v50  ;;  %v268_v53 = vmul.f32 %v721_v50, %v267_v48 }
  0x73   : > { %v725_v55 = vpop.eup %724  ;;  %585 = vst [vmem:[%s1126_s6 + $0x2] sm:$0x3] %v723_v52  ;;  %v276_v56 = vadd.f32 %v723_v52, %v721_v50  ;;  %v279_v57 = vmul.f32 %v723_v52, %v278_v49 }
  0x74   : > { %v727_v58 = vpop.eup %726  ;;  %588 = vst [vmem:[%s1126_s6 + $0x4] sm:$0x3] %v725_v55  ;;  %v290_v59 = vmul.f32 %v725_v55, %v289_v51 }
  0x75   : > { %v729_v61 = vpop.eup %728  ;;  %v287_v62 = vadd.f32 %v725_v55, %v276_v56  ;;  %591 = vst [vmem:[%s1126_s6 + $0x6] sm:$0x3] %v727_v58  ;;  %v280_v63 = vadd.f32 %v279_v57, %v268_v53  ;;  %v301_v0 = vmul.f32 %v727_v58, %v300_v54 }
  0x76   : > { %v731_v1 = vpop.eup %730  ;;  %594 = vst [vmem:[%s1126_s6 + $0x8] sm:$0x3] %v729_v61  ;;  %v312_v5 = vmul.f32 %v729_v61, %v311_v60 }
  0x77   : > { %v733_v2 = vpop.eup %732  ;;  %v298_v3 = vadd.f32 %v727_v58, %v287_v62  ;;  %597 = vst [vmem:[%s1126_s6 + $0xa] sm:$0x3] %v731_v1  ;;  %v291_v4 = vadd.f32 %v290_v59, %v280_v63  ;;  %v323_v12 = vmul.f32 %v731_v1, %v322_v6 }
  0x78   : > { %v735_v7 = vpop.eup %734  ;;  %600 = vst [vmem:[%s1126_s6 + $0xc] sm:$0x3] %v733_v2  ;;  %v334_v18 = vmul.f32 %v733_v2, %v333_v15 }
  0x79   : > { %v737_v8 = vpop.eup %736  ;;  %v309_v9 = vadd.f32 %v729_v61, %v298_v3  ;;  %603 = vst [vmem:[%s1126_s6 + $0xe] sm:$0x3] %v735_v7  ;;  %v302_v10 = vadd.f32 %v301_v0, %v291_v4  ;;  %v345_v23 = vmul.f32 %v735_v7, %v344_v20  ;;  %v370_v31 = vld [vmem:[%s1126_s6] sm:$0x3] }
  0x7a   : > { %v739_v11 = vpop.eup %738  ;;  %606 = vst [vmem:[%s1126_s6 + $0x10] sm:$0x3] %v737_v8  ;;  %v356_v27 = vmul.f32 %v737_v8, %v355_v25  ;;  %v611_v32 = vld [vmem:[%s1126_s6 + $0x2] sm:$0x3] }
  0x7b   : > { %v320_v13 = vadd.f32 %v731_v1, %v309_v9  ;;  %609 = vst [vmem:[%s1126_s6 + $0x12] sm:$0x3] %v739_v11  ;;  %v313_v14 = vadd.f32 %v312_v5, %v302_v10  ;;  %v367_v30 = vmul.f32 %v739_v11, %v366_v28  ;;  %v613_v33 = vld [vmem:[%s1126_s6 + $0x4] sm:$0x3] }
  0x7c   : > { %v615_v34 = vld [vmem:[%s1126_s6 + $0x6] sm:$0x3] }
  0x7d   : > { %v331_v16 = vadd.f32 %v733_v2, %v320_v13  ;;  %v324_v17 = vadd.f32 %v323_v12, %v313_v14  ;;  %v617_v35 = vld [vmem:[%s1126_s6 + $0x8] sm:$0x3] }
  0x7e   : > { %v619_v36 = vld [vmem:[%s1126_s6 + $0xa] sm:$0x3] }
  0x7f   : > { %v342_v19 = vadd.f32 %v735_v7, %v331_v16  ;;  %v335_v22 = vadd.f32 %v334_v18, %v324_v17  ;;  %v621_v37 = vld [vmem:[%s1126_s6 + $0xc] sm:$0x3] }
  0x80   : > { %v623_v38 = vld [vmem:[%s1126_s6 + $0xe] sm:$0x3] }
  0x81   : > { %v353_v21 = vadd.f32 %v737_v8, %v342_v19  ;;  %v346_v26 = vadd.f32 %v345_v23, %v335_v22  ;;  %v625_v41 = vld [vmem:[%s1126_s6 + $0x10] sm:$0x3] }
  0x82   : > { %v627_v42 = vld [vmem:[%s1126_s6 + $0x12] sm:$0x3] }
  0x83   : > { %v364_v24 = vadd.f32 %v739_v11, %v353_v21  ;;  %v357_v29 = vadd.f32 %v356_v27, %v346_v26 }
  0x85   : > { %740 = vrcp.f32 %v364_v24  ;;  %v368_v39 = vadd.f32 %v367_v30, %v357_v29 }
  0x8f   : > { %v741_v40 = vpop.eup %740 }
  0x90   : > { %v371_v43 = vmul.f32 %v741_v40, %v370_v31  ;;  %v374_v44 = vmul.f32 %v741_v40, %v611_v32  ;;  %v377_v45 = vmul.f32 %v741_v40, %v613_v33  ;;  %v380_v46 = vmul.f32 %v741_v40, %v615_v34 }
  0x91   : > { %v383_v47 = vmul.f32 %v741_v40, %v617_v35  ;;  %v386_v48 = vmul.f32 %v741_v40, %v619_v36  ;;  %v389_v49 = vmul.f32 %v741_v40, %v621_v37  ;;  %v392_v50 = vmul.f32 %v741_v40, %v623_v38 }
  0x92   : > { %372 = vst [vmem:[%s1126_s6] sm:$0x3] %v371_v43  ;;  %612 = vst [vmem:[%s1126_s6 + $0x2] sm:$0x3] %v374_v44  ;;  %v395_v51 = vmul.f32 %v741_v40, %v625_v41  ;;  %v398_v52 = vmul.f32 %v741_v40, %v627_v42  ;;  %v400_v53 = vmul.f32 %v741_v40, %v368_v39 }
  0x93   : > { %614 = vst [vmem:[%s1126_s6 + $0x4] sm:$0x3] %v377_v45  ;;  %616 = vst [vmem:[%s1126_s6 + $0x6] sm:$0x3] %v380_v46 }
  0x94   : > { %618 = vst [vmem:[%s1126_s6 + $0x8] sm:$0x3] %v383_v47  ;;  %620 = vst [vmem:[%s1126_s6 + $0xa] sm:$0x3] %v386_v48 }
  0x95   : > { %622 = vst [vmem:[%s1126_s6 + $0xc] sm:$0x3] %v389_v49  ;;  %624 = vst [vmem:[%s1126_s6 + $0xe] sm:$0x3] %v392_v50 }
  0x96   : > { %626 = vst [vmem:[%s1126_s6 + $0x10] sm:$0x3] %v395_v51  ;;  %628 = vst [vmem:[%s1126_s6 + $0x12] sm:$0x3] %v398_v52 }
  0x97   : > { %401 = vst [vmem:[%s1145_s9] sm:$0x3] %v400_v53 }
  0x98   : > { %800 = shalt.err (!%p797_p9)
}
  0x99   : > { %s801_s6 = scalar_lea.hbm %s1166_s30, 32  ;;  %s805_s19 = scalar_lea.hbm %s1259_s2, 64 }
  0x9a   : > { %p802_p4 = scmp.ne.s32.totalorder %s1166_s30, %s801_s6  ;;  %p806_p5 = scmp.lt.u32.totalorder %s1166_s30, %s1259_s2 }
  0x9b   : > { %p807_p3 = scmp.lt.u32.totalorder %s805_s19, %s801_s6  ;;  %p809_p12 = scmp.lt.u32.totalorder %s801_s6, %s1166_s30 }
  0x9c   : > { %p803_p10 = pnand %p802_p4, %p1276_p2 }
  0x9d   : > { %p808_p7 = por %p807_p3, %p806_p5 }
  0x9e   : > { %p804_p11 = pneg %p803_p10 }
  0x9f   : > { %p810_p13 = por %p809_p12, %p808_p7 }
  0xa1   : > { %p811_p6 = pnand %p810_p13, %p804_p11 }
  0xa3   : > { %814 = shalt.err (!%p811_p6)
}
  0xa4   : > { %644 = dma.vmem_to_hbm [thread:$0]  (%p1276_p2), %s1160_s10, 32, %s1166_s30, %s403_s7  }
  0xa5   : > { %s408_s26 = scalar_lea.sflag [#allocation9], %s1080_s11  ;;  %s815_s4 = scalar_lea.vmem %s1183_s21, 320 }
  0xa6   : > { %p816_p0 = scmp.ne.s32.totalorder %s1183_s21, %s815_s4  ;;  %s912_s22 = smov [#allocation8]  }
  0xa7   : > { %s819_s15 = sshll.u32 %s912_s22, 4  ;;  %s820_s15 = int_to_ptr.vmem [resolvable:$false] %s819_s15 }
  0xa8   : > { %p817_p1 = pnand %p816_p0, %p1276_p2  ;;  %s821_s27 = scalar_lea.vmem %s820_s15, 640 }
  0xa9   : > { %p822_p9 = scmp.lt.s32.totalorder %s1183_s21, %s820_s15  ;;  %p823_p4 = scmp.lt.s32.totalorder %s821_s27, %s815_s4 }
  0xaa   : > { %p818_p8 = pneg %p817_p1 }
  0xab   : > { %p824_p10 = por %p823_p4, %p822_p9 }
  0xad   : > { %p825_p11 = pnand %p824_p10, %p818_p8 }
  0xaf   : > { %828 = shalt.err (!%p825_p11)
}
  0xb0   : > { %s829_s10 = scalar_lea.hbm %s1177_s20, 320  ;;  %s833_s8 = scalar_lea.hbm %s1260_s3, 640 }
  0xb1   : > { %p830_p5 = scmp.ne.s32.totalorder %s1177_s20, %s829_s10  ;;  %p834_p12 = scmp.lt.u32.totalorder %s1177_s20, %s1260_s3 }
  0xb2   : > { %p835_p13 = scmp.lt.u32.totalorder %s833_s8, %s829_s10  ;;  %p837_p0 = scmp.lt.u32.totalorder %s829_s10, %s1177_s20 }
  0xb3   : > { %p831_p3 = pnand %p830_p5, %p1276_p2 }
  0xb4   : > { %p836_p6 = por %p835_p13, %p834_p12 }
  0xb5   : > { %p832_p7 = pneg %p831_p3 }
  0xb6   : > { %p838_p1 = por %p837_p0, %p836_p6 }
  0xb8   : > { %p839_p8 = pnand %p838_p1, %p832_p7 }
  0xba   : > { %842 = shalt.err (!%p839_p8)
}
  0xbb   : > { %s913_s18 = smov 32   ;;  %s914_s19 = smov 2  }
  0xbc   : > { %645 = dma.vmem_to_hbm [thread:$0]  (%p1276_p2), %s1183_s21, 320, %s1177_s20, %s408_s26, %s913_s18, %s913_s18, %s914_s19  }
  0xbd PF: > { %s451_s23 = sand.u32 1, %s885_s12   ;;  %p1277_p9 = scmp.ne.s32.totalorder %s1269_s25, 0 }
  0xbe   : > { %p1278_p4 = scmp.ge.s32.totalorder %s905_s17, 2  ;;  %s452_s29 = scalar_lea.sflag [#allocation4], %s451_s23 }
  0xc0   : > { %p657_p10 = pnand %p1278_p4, %p1277_p9 }
  0xc2   : > { %876 = dma.done.wait (!%p657_p10), %s452_s29, 32  }
  0xc3   : > { %878 = vsyncadd (!%p657_p10), %s452_s29, 4294967264  ;;  %s461_s4 = scalar_lea.sflag [#allocation9], %s451_s23 }
  0xc4   : > { %880 = dma.done.wait (!%p657_p10), %s461_s4, 320  }
  0xc5   : > { %882 = vsyncadd (!%p657_p10), %s461_s4, 4294966976  ;;  %s24_s17 = sadd.s32 1, %s905_s17   ;;  %s1279_s12 = smov %s889_s13 }
  0xc6   : > { %p21_p11 = scmp.ge.s32.totalorder %s24_s17, 4   ;;  %s1280_s13 = smov %s893_s14 }
  0xc7   : > { %s1281_s14 = smov %s1045_s28  ;;  %s1282_s15 = smov %s901_s16 }
  0xc8   : > { %s1283_s16 = smov %s1285_s5  ;;  %23 = sbr.rel (!%p21_p11) target bundleno = 9 (0x9), region = 113 }
  0xcf   :  { %466 = vsyncpa [#allocation3], 1 }
  0xd0   :  { %468 = vsyncpa [#allocation3 + $0x1], 1 }
  0xd1   :  { %469 = vsyncpa [#allocation4], 1 }
  0xd2   :  { %471 = vsyncpa [#allocation4 + $0x1], 1 }
  0xd3   :  { %472 = vsyncpa [#allocation9], 1 }
  0xd4   :  { %474 = vsyncpa [#allocation9 + $0x1], 1 }
  0xd5   :  { %475 = vsyncpa [#allocation5], 1 }
  0xd6   :  { %477 = vsyncpa [#allocation5 + $0x1], 1 }

</bundles_post_ra>
